<compile_context>
chip_gen: v7x
topology: tpu7x:2x2x1
jax: 0.10.0
libtpu: 0.0.40
codegen_flags: <defaults>
</compile_context>

<pallas_src>
import functools

import jax
import jax.numpy as jnp
from jax import lax
from jax.experimental import pallas as pl
from jax.experimental.pallas import tpu as pltpu


def _gaussian_1d(kernel_size, sigma):
    offs = jnp.arange(kernel_size, dtype=jnp.float32) - (kernel_size - 1) / 2.0
    g = jnp.exp(-0.5 * (offs / sigma) ** 2)
    return g / jnp.sum(g)


def _band_matrices(h, w, kernel_size, sigma):
    """Banded matrices implementing a 'valid' separable gaussian filter as matmuls.

    (ghT @ x @ gw)[r, c] = sum_{u,v} g[u] g[v] x[r+u, c+v]
    """
    g = _gaussian_1d(kernel_size, sigma)
    ho = h - kernel_size + 1
    wo = w - kernel_size + 1
    di = jnp.arange(w)[:, None] - jnp.arange(wo)[None, :]
    gw = jnp.where((di >= 0) & (di < kernel_size),
                   g[jnp.clip(di, 0, kernel_size - 1)], 0.0)          # (W, Wo)
    dj = jnp.arange(h)[None, :] - jnp.arange(ho)[:, None]
    ghT = jnp.where((dj >= 0) & (dj < kernel_size),
                    g[jnp.clip(dj, 0, kernel_size - 1)], 0.0)         # (Ho, H)
    return ghT.astype(jnp.float32), gw.astype(jnp.float32)


def _psnr_ssim_kernel(x_ref, y_ref, ghT_ref, gw_ref, out_ref, stack_ref, *, c1, c2):
    """One (batch, channel) image pair per grid step: emits [ssim_map_sum, sse]."""
    x = x_ref[0]                       # (H, W) f32
    y = y_ref[0]

    # --- PSNR partial: sum of squared error over the full image -------------
    diff = x - y
    sse = jnp.sum(diff * diff)

    # --- SSIM: separable gaussian filtering folded into MXU matmuls ---------
    h = x.shape[0]
    stack_ref[0 * h:1 * h, :] = x
    stack_ref[1 * h:2 * h, :] = y
    stack_ref[2 * h:3 * h, :] = x * x
    stack_ref[3 * h:4 * h, :] = y * y
    stack_ref[4 * h:5 * h, :] = x * y

    # Horizontal filter for all 5 maps at once: (5H, W) @ (W, Wo).
    t = jnp.dot(stack_ref[...], gw_ref[...], preferred_element_type=jnp.float32)
    ghT = ghT_ref[...]                 # (Ho, H)
    # Vertical filter per map: (Ho, H) @ (H, Wo) -> (Ho, Wo).
    mu_x = jnp.dot(ghT, t[0 * h:1 * h], preferred_element_type=jnp.float32)
    mu_y = jnp.dot(ghT, t[1 * h:2 * h], preferred_element_type=jnp.float32)
    e_xx = jnp.dot(ghT, t[2 * h:3 * h], preferred_element_type=jnp.float32)
    e_yy = jnp.dot(ghT, t[3 * h:4 * h], preferred_element_type=jnp.float32)
    e_xy = jnp.dot(ghT, t[4 * h:5 * h], preferred_element_type=jnp.float32)

    mu_x2 = mu_x * mu_x
    mu_y2 = mu_y * mu_y
    mu_xy = mu_x * mu_y
    var_x = e_xx - mu_x2
    var_y = e_yy - mu_y2
    cov = e_xy - mu_xy

    num = (2.0 * mu_xy + c1) * (2.0 * cov + c2)
    den = (mu_x2 + mu_y2 + c1) * (var_x + var_y + c2)
    ssim_sum = jnp.sum(num / den)

    # Lane-dense output block: lane 0 = SSIM-map sum, lane 1 = squared-error sum.
    lane = lax.broadcasted_iota(jnp.int32, out_ref.shape, 2)
    out_ref[...] = jnp.where(lane == 0, ssim_sum,
                             jnp.where(lane == 1, sse, 0.0))


def rgb_metrics(pred, gt, *, data_range=1.0, kernel_size=11, sigma=1.5,
                k1=0.01, k2=0.03):
    """Forward pass of RGBMetrics: (psnr, ssim, lpips)."""
    pred = (pred.astype(jnp.float32) / 255.0
            if pred.dtype == jnp.uint8 else pred.astype(jnp.float32))
    gt = (gt.astype(jnp.float32) / 255.0
          if gt.dtype == jnp.uint8 else gt.astype(jnp.float32))

    b, c, h, w = pred.shape
    ho = h - kernel_size + 1
    wo = w - kernel_size + 1
    ghT, gw = _band_matrices(h, w, kernel_size, sigma)
    c1 = (k1 * data_range) ** 2
    c2 = (k2 * data_range) ** 2

    x = pred.reshape(b * c, h, w)
    y = gt.reshape(b * c, h, w)

    kernel = functools.partial(_psnr_ssim_kernel, c1=c1, c2=c2)
    out = pl.pallas_call(
        kernel,
        out_shape=jax.ShapeDtypeStruct((b * c, 1, 128), jnp.float32),
        grid_spec=pltpu.PrefetchScalarGridSpec(
            num_scalar_prefetch=0,
            grid=(b * c,),
            in_specs=[
                pl.BlockSpec((1, h, w), lambda g: (g, 0, 0)),
                pl.BlockSpec((1, h, w), lambda g: (g, 0, 0)),
                pl.BlockSpec((ho, h), lambda g: (0, 0)),
                pl.BlockSpec((w, wo), lambda g: (0, 0)),
            ],
            out_specs=pl.BlockSpec((1, 1, 128), lambda g: (g, 0, 0)),
            scratch_shapes=[pltpu.VMEM((5 * h, w), jnp.float32)],
        ),
        compiler_params=pltpu.CompilerParams(
            dimension_semantics=("parallel",)),
    )(x, y, ghT, gw)

    ssim_sums = out[:, 0, 0].reshape(b, c)
    sse_sums = out[:, 0, 1]

    ssim_per_image = jnp.sum(ssim_sums, axis=1) / (c * ho * wo)
    ssim_score = jnp.mean(ssim_per_image)

    mse = jnp.sum(sse_sums) / (b * c * h * w)
    psnr_score = 10.0 * jnp.log10(data_range ** 2 / mse)

    # TODO(synk): LPIPS (LearnedPerceptualImagePatchSimilarity) needs pretrained
    # AlexNet/VGG feature weights; no file/network access here, so return NaN.
    lpips_score = jnp.float32(jnp.nan)
    return psnr_score, ssim_score, lpips_score


def _ref_psnr_ssim(pred, gt, *, data_range=1.0, kernel_size=11, sigma=1.5,
                   k1=0.01, k2=0.03):
    """Pure-JAX reference (stands in for torchmetrics PSNR / SSIM)."""
    pred = pred.astype(jnp.float32)
    gt = gt.astype(jnp.float32)
    b, c, _, _ = pred.shape

    mse = jnp.mean((pred - gt) ** 2)
    psnr = 10.0 * jnp.log10(data_range ** 2 / mse)

    g = _gaussian_1d(kernel_size, sigma)
    k2d = jnp.outer(g, g)
    kern = jnp.tile(k2d[None, None], (c, 1, 1, 1))

    def filt(z):
        return lax.conv_general_dilated(
            z, kern, window_strides=(1, 1), padding="VALID",
            dimension_numbers=("NCHW", "OIHW", "NCHW"),
            feature_group_count=c, precision=lax.Precision.HIGHEST)

    mu_x, mu_y = filt(pred), filt(gt)
    e_xx, e_yy, e_xy = filt(pred * pred), filt(gt * gt), filt(pred * gt)
    c1 = (k1 * data_range) ** 2
    c2 = (k2 * data_range) ** 2
    var_x = e_xx - mu_x ** 2
    var_y = e_yy - mu_y ** 2
    cov = e_xy - mu_x * mu_y
    ssim_map = ((2 * mu_x * mu_y + c1) * (2 * cov + c2)) / \
               ((mu_x ** 2 + mu_y ** 2 + c1) * (var_x + var_y + c2))
    ssim = jnp.mean(ssim_map.reshape(b, -1).mean(axis=-1))
    return psnr, ssim


if __name__ == "__main__":
    key = jax.random.PRNGKey(0)
    ka, kb = jax.random.split(key)
    # small RGB image batch: (B=2, C=3, H=32, W=32) in [0, 1]
    pred = jax.random.uniform(ka, (2, 3, 32, 32), dtype=jnp.float32)
    gt = jnp.clip(pred + 0.1 * jax.random.normal(kb, pred.shape, dtype=jnp.float32),
                  0.0, 1.0)

    psnr_score, ssim_score, lpips_score = rgb_metrics(pred, gt)
    jax.block_until_ready((psnr_score, ssim_score, lpips_score))

    psnr_ref, ssim_ref = _ref_psnr_ssim(pred, gt)
    assert jnp.allclose(psnr_score, psnr_ref, rtol=1e-2, atol=1e-2), \
        (float(psnr_score), float(psnr_ref))
    assert jnp.allclose(ssim_score, ssim_ref, rtol=1e-2, atol=1e-2), \
        (float(ssim_score), float(ssim_ref))

    print("KERNEL_OK")
</pallas_src>

<mosaic_0001>
module attributes {stable_mosaic.version = 11 : i64} {
  func.func @_psnr_ssim_kernel(%arg0: i32, %arg1: memref<1x32x32xf32, #tpu.memory_space<vmem>>, %arg2: memref<1x32x32xf32, #tpu.memory_space<vmem>>, %arg3: memref<22x32xf32, #tpu.memory_space<vmem>>, %arg4: memref<32x22xf32, #tpu.memory_space<vmem>>, %arg5: memref<1x1x128xf32, #tpu.memory_space<vmem>>, %arg6: memref<160x32xf32, #tpu.memory_space<vmem>>) attributes {dimension_semantics = [#tpu.dimension_semantics<parallel>], iteration_bounds = array<i64: 6>, scalar_prefetch = 0 : i64, scratch_operands = 1 : i64, tpu.core_type = #tpu.core_type<tc>, window_params = [{transform_indices = @transform_0, window_bounds = array<i64: 1, 32, 32>}, {transform_indices = @transform_1, window_bounds = array<i64: 1, 32, 32>}, {pipeline_mode = #tpu.pipeline_mode<synchronous>, transform_indices = @transform_2, window_bounds = array<i64: 22, 32>}, {pipeline_mode = #tpu.pipeline_mode<synchronous>, transform_indices = @transform_3, window_bounds = array<i64: 32, 22>}, {transform_indices = @transform_4, window_bounds = array<i64: 1, 1, 128>}]} {
    %c0 = arith.constant 0 : index
    %c0_0 = arith.constant 0 : index
    %c0_1 = arith.constant 0 : index
    %0 = vector.load %arg1[%c0, %c0_0, %c0_1] : memref<1x32x32xf32, #tpu.memory_space<vmem>>, vector<1x32x32xf32>
    %1 = vector.shape_cast %0 : vector<1x32x32xf32> to vector<32x32xf32>
    %c0_2 = arith.constant 0 : index
    %c0_3 = arith.constant 0 : index
    %c0_4 = arith.constant 0 : index
    %2 = vector.load %arg2[%c0_2, %c0_3, %c0_4] : memref<1x32x32xf32, #tpu.memory_space<vmem>>, vector<1x32x32xf32>
    %3 = vector.shape_cast %2 : vector<1x32x32xf32> to vector<32x32xf32>
    %4 = arith.subf %1, %3 : vector<32x32xf32>
    %5 = arith.mulf %4, %4 : vector<32x32xf32>
    %6 = vector.shape_cast %5 : vector<32x32xf32> to vector<1x32x32xf32>
    %cst = arith.constant dense<0.000000e+00> : vector<1xf32>
    %7 = vector.multi_reduction <add>, %6, %cst [1, 2] : vector<1x32x32xf32> to vector<1xf32>
    %8 = vector.shape_cast %7 : vector<1xf32> to vector<1x1x1xf32>
    %9 = vector.extract %8[0, 0, 0] : f32 from vector<1x1x1xf32>
    %c0_5 = arith.constant 0 : index
    %c0_6 = arith.constant 0 : index
    %10 = vector.load %arg6[%c0_5, %c0_6] : memref<160x32xf32, #tpu.memory_space<vmem>>, vector<32x32xf32>
    tpu.vector_store %arg6[%c0_5, %c0_6], %1 {strides = array<i32>} : memref<160x32xf32, #tpu.memory_space<vmem>>, vector<32x32xf32>,
    %c32 = arith.constant 32 : index
    %c0_7 = arith.constant 0 : index
    %11 = vector.load %arg6[%c32, %c0_7] : memref<160x32xf32, #tpu.memory_space<vmem>>, vector<32x32xf32>
    tpu.vector_store %arg6[%c32, %c0_7], %3 {strides = array<i32>} : memref<160x32xf32, #tpu.memory_space<vmem>>, vector<32x32xf32>,
    %12 = arith.mulf %1, %1 : vector<32x32xf32>
    %c64 = arith.constant 64 : index
    %c0_8 = arith.constant 0 : index
    %13 = vector.load %arg6[%c64, %c0_8] : memref<160x32xf32, #tpu.memory_space<vmem>>, vector<32x32xf32>
    tpu.vector_store %arg6[%c64, %c0_8], %12 {strides = array<i32>} : memref<160x32xf32, #tpu.memory_space<vmem>>, vector<32x32xf32>,
    %14 = arith.mulf %3, %3 : vector<32x32xf32>
    %c96 = arith.constant 96 : index
    %c0_9 = arith.constant 0 : index
    %15 = vector.load %arg6[%c96, %c0_9] : memref<160x32xf32, #tpu.memory_space<vmem>>, vector<32x32xf32>
    tpu.vector_store %arg6[%c96, %c0_9], %14 {strides = array<i32>} : memref<160x32xf32, #tpu.memory_space<vmem>>, vector<32x32xf32>,
    %16 = arith.mulf %1, %3 : vector<32x32xf32>
    %c128 = arith.constant 128 : index
    %c0_10 = arith.constant 0 : index
    %17 = vector.load %arg6[%c128, %c0_10] : memref<160x32xf32, #tpu.memory_space<vmem>>, vector<32x32xf32>
    tpu.vector_store %arg6[%c128, %c0_10], %16 {strides = array<i32>} : memref<160x32xf32, #tpu.memory_space<vmem>>, vector<32x32xf32>,
    %c0_11 = arith.constant 0 : index
    %c0_12 = arith.constant 0 : index
    %18 = vector.load %arg6[%c0_11, %c0_12] : memref<160x32xf32, #tpu.memory_space<vmem>>, vector<160x32xf32>
    %c0_13 = arith.constant 0 : index
    %c0_14 = arith.constant 0 : index
    %19 = vector.load %arg4[%c0_13, %c0_14] : memref<32x22xf32, #tpu.memory_space<vmem>>, vector<32x22xf32>
    %cst_15 = arith.constant dense<0.000000e+00> : vector<160x22xf32>
    %20 = tpu.matmul %18, %19, %cst_15 {dimension_numbers = #tpu.dot_dimension_numbers<[1], [0], [0], [1], [0, 0, 1, 1], [], []>} : vector<160x32xf32>, vector<32x22xf32>, vector<160x22xf32> -> vector<160x22xf32>
    %c0_16 = arith.constant 0 : index
    %c0_17 = arith.constant 0 : index
    %21 = vector.load %arg3[%c0_16, %c0_17] : memref<22x32xf32, #tpu.memory_space<vmem>>, vector<22x32xf32>
    %22 = vector.extract_strided_slice %20 {offsets = [0, 0], sizes = [32, 22], strides = [1, 1]} : vector<160x22xf32> to vector<32x22xf32>
    %cst_18 = arith.constant dense<0.000000e+00> : vector<22x22xf32>
    %23 = tpu.matmul %21, %22, %cst_18 {dimension_numbers = #tpu.dot_dimension_numbers<[1], [0], [0], [1], [0, 0, 1, 1], [], []>} : vector<22x32xf32>, vector<32x22xf32>, vector<22x22xf32> -> vector<22x22xf32>
    %24 = vector.extract_strided_slice %20 {offsets = [32, 0], sizes = [32, 22], strides = [1, 1]} : vector<160x22xf32> to vector<32x22xf32>
    %cst_19 = arith.constant dense<0.000000e+00> : vector<22x22xf32>
    %25 = tpu.matmul %21, %24, %cst_19 {dimension_numbers = #tpu.dot_dimension_numbers<[1], [0], [0], [1], [0, 0, 1, 1], [], []>} : vector<22x32xf32>, vector<32x22xf32>, vector<22x22xf32> -> vector<22x22xf32>
    %26 = vector.extract_strided_slice %20 {offsets = [64, 0], sizes = [32, 22], strides = [1, 1]} : vector<160x22xf32> to vector<32x22xf32>
    %cst_20 = arith.constant dense<0.000000e+00> : vector<22x22xf32>
    %27 = tpu.matmul %21, %26, %cst_20 {dimension_numbers = #tpu.dot_dimension_numbers<[1], [0], [0], [1], [0, 0, 1, 1], [], []>} : vector<22x32xf32>, vector<32x22xf32>, vector<22x22xf32> -> vector<22x22xf32>
    %28 = vector.extract_strided_slice %20 {offsets = [96, 0], sizes = [32, 22], strides = [1, 1]} : vector<160x22xf32> to vector<32x22xf32>
    %cst_21 = arith.constant dense<0.000000e+00> : vector<22x22xf32>
    %29 = tpu.matmul %21, %28, %cst_21 {dimension_numbers = #tpu.dot_dimension_numbers<[1], [0], [0], [1], [0, 0, 1, 1], [], []>} : vector<22x32xf32>, vector<32x22xf32>, vector<22x22xf32> -> vector<22x22xf32>
    %30 = vector.extract_strided_slice %20 {offsets = [128, 0], sizes = [32, 22], strides = [1, 1]} : vector<160x22xf32> to vector<32x22xf32>
    %cst_22 = arith.constant dense<0.000000e+00> : vector<22x22xf32>
    %31 = tpu.matmul %21, %30, %cst_22 {dimension_numbers = #tpu.dot_dimension_numbers<[1], [0], [0], [1], [0, 0, 1, 1], [], []>} : vector<22x32xf32>, vector<32x22xf32>, vector<22x22xf32> -> vector<22x22xf32>
    %32 = arith.mulf %23, %23 : vector<22x22xf32>
    %33 = arith.mulf %25, %25 : vector<22x22xf32>
    %34 = arith.mulf %23, %25 : vector<22x22xf32>
    %35 = arith.subf %27, %32 : vector<22x22xf32>
    %36 = arith.subf %29, %33 : vector<22x22xf32>
    %37 = arith.subf %31, %34 : vector<22x22xf32>
    %cst_23 = arith.constant 2.000000e+00 : f32
    %38 = vector.broadcast %cst_23 : f32 to vector<22x22xf32>
    %39 = arith.mulf %38, %34 : vector<22x22xf32>
    %cst_24 = arith.constant 9.99999974E-5 : f32
    %40 = vector.broadcast %cst_24 : f32 to vector<22x22xf32>
    %41 = arith.addf %39, %40 : vector<22x22xf32>
    %cst_25 = arith.constant 2.000000e+00 : f32
    %42 = vector.broadcast %cst_25 : f32 to vector<22x22xf32>
    %43 = arith.mulf %42, %37 : vector<22x22xf32>
    %cst_26 = arith.constant 8.99999984E-4 : f32
    %44 = vector.broadcast %cst_26 : f32 to vector<22x22xf32>
    %45 = arith.addf %43, %44 : vector<22x22xf32>
    %46 = arith.mulf %41, %45 : vector<22x22xf32>
    %47 = arith.addf %32, %33 : vector<22x22xf32>
    %cst_27 = arith.constant 9.99999974E-5 : f32
    %48 = vector.broadcast %cst_27 : f32 to vector<22x22xf32>
    %49 = arith.addf %47, %48 : vector<22x22xf32>
    %50 = arith.addf %35, %36 : vector<22x22xf32>
    %cst_28 = arith.constant 8.99999984E-4 : f32
    %51 = vector.broadcast %cst_28 : f32 to vector<22x22xf32>
    %52 = arith.addf %50, %51 : vector<22x22xf32>
    %53 = arith.mulf %49, %52 : vector<22x22xf32>
    %54 = arith.divf %46, %53 : vector<22x22xf32>
    %55 = vector.shape_cast %54 : vector<22x22xf32> to vector<1x22x22xf32>
    %cst_29 = arith.constant dense<0.000000e+00> : vector<1xf32>
    %56 = vector.multi_reduction <add>, %55, %cst_29 [1, 2] : vector<1x22x22xf32> to vector<1xf32>
    %57 = vector.shape_cast %56 : vector<1xf32> to vector<1x1x1xf32>
    %58 = vector.extract %57[0, 0, 0] : f32 from vector<1x1x1xf32>
    %59 = tpu.iota {dimensions = array<i32: 2>} : vector<1x1x128xi32>
    %c0_i32 = arith.constant 0 : i32
    %60 = vector.broadcast %c0_i32 : i32 to vector<1x1x128xi32>
    %61 = arith.cmpi eq, %59, %60 : vector<1x1x128xi32>
    %c1_i32 = arith.constant 1 : i32
    %62 = vector.broadcast %c1_i32 : i32 to vector<1x1x128xi32>
    %63 = arith.cmpi eq, %59, %62 : vector<1x1x128xi32>
    %cst_30 = arith.constant 0.000000e+00 : f32
    %64 = vector.broadcast %9 : f32 to vector<1x1x128xf32>
    %65 = vector.broadcast %cst_30 : f32 to vector<1x1x128xf32>
    %66 = arith.select %63, %64, %65 : vector<1x1x128xi1>, vector<1x1x128xf32>
    %67 = vector.broadcast %58 : f32 to vector<1x1x128xf32>
    %68 = arith.select %61, %67, %66 : vector<1x1x128xi1>, vector<1x1x128xf32>
    %c0_31 = arith.constant 0 : index
    %c0_32 = arith.constant 0 : index
    %c0_33 = arith.constant 0 : index
    %69 = vector.load %arg5[%c0_31, %c0_32, %c0_33] : memref<1x1x128xf32, #tpu.memory_space<vmem>>, vector<1x1x128xf32>
    tpu.vector_store %arg5[%c0_31, %c0_32, %c0_33], %68 {strides = array<i32>} : memref<1x1x128xf32, #tpu.memory_space<vmem>>, vector<1x1x128xf32>,
    return
  }
  func.func @transform_0(%arg0: i32) -> (i32, i32, i32) {
    %c0_i32 = arith.constant 0 : i32
    %c0_i32_0 = arith.constant 0 : i32
    %c0_i32_1 = arith.constant 0 : i32
    return %arg0, %c0_i32, %c0_i32_0 : i32, i32, i32
  }
  func.func @transform_1(%arg0: i32) -> (i32, i32, i32) {
    %c0_i32 = arith.constant 0 : i32
    %c0_i32_0 = arith.constant 0 : i32
    %c0_i32_1 = arith.constant 0 : i32
    return %arg0, %c0_i32, %c0_i32_0 : i32, i32, i32
  }
  func.func @transform_2(%arg0: i32) -> (i32, i32) {
    %c0_i32 = arith.constant 0 : i32
    %c0_i32_0 = arith.constant 0 : i32
    %c0_i32_1 = arith.constant 0 : i32
    return %c0_i32, %c0_i32_0 : i32, i32
  }
  func.func @transform_3(%arg0: i32) -> (i32, i32) {
    %c0_i32 = arith.constant 0 : i32
    %c0_i32_0 = arith.constant 0 : i32
    %c0_i32_1 = arith.constant 0 : i32
    return %c0_i32, %c0_i32_0 : i32, i32
  }
  func.func @transform_4(%arg0: i32) -> (i32, i32, i32) {
    %c0_i32 = arith.constant 0 : i32
    %c0_i32_0 = arith.constant 0 : i32
    %c0_i32_1 = arith.constant 0 : i32
    return %arg0, %c0_i32, %c0_i32_0 : i32, i32, i32
  }
}

</mosaic_0001>

<bundles_post_ra>
// kernel: tpu_custom_call.1
= control target key start
LH: loop header
LB: loop body
LE: loop exit
PB: predicated region body
PF: predicated region fallthrough
CT: control target
= control target key end

     0   :  { %9 = vsyncpa [#allocation4], 0  ;;  %s2061_s0 = inlined_call_operand.hbm [shape: f32[6,32,32], index: 0, kind: input, shape index: {}]   ;;  %s2062_s1 = inlined_call_operand.hbm [shape: f32[6,32,32], index: 1, kind: input, shape index: {}]   ;;  %s2063_s2 = inlined_call_operand.vmem [shape: f32[22,32], index: 2, kind: input, shape index: {}]   ;;  %s2064_s3 = inlined_call_operand.vmem [shape: f32[32,22], index: 3, kind: input, shape index: {}]   ;;  %s2065_s4 = inlined_call_operand.hbm [shape: f32[6,1,128], index: 4, kind: output, shape index: {}]  }
   0x1   :  { %11 = vsyncpa [#allocation4 + $0x1], 0 }
   0x2   :  { %12 = vsyncpa [#allocation7], 0 }
   0x3   :  { %14 = vsyncpa [#allocation7 + $0x1], 0 }
   0x4   :  { %15 = vsyncpa [#allocation5], 0 }
   0x5   :  { %17 = vsyncpa [#allocation5 + $0x1], 0  ;;  %s1665_s15 = smov 0   ;;  %s1667_s16 = smov 0  }
   0x6   :  { %s1669_s17 = smov 0   ;;  %s1671_s18 = smov 0  }
   0x7 LB: > { %s1686_s19 = sadd.s32 4294967295, %s1630_s18   ;;  %s1162_s20 = sadd.s32 4294967294, %s1630_s18   ;;  %s1630_s18 = sphi %s1671_s18, %s2080_s18   ;;  %s1626_s17 = sphi %s1669_s17, %s2079_s17   ;;  %s1622_s16 = sphi %s1667_s16, %s2078_s16   ;;  %s1618_s15 = sphi %s1665_s15, %s2077_s15  }
   0x8   : > { %s1690_s21 = sadd.s32 1, %s1630_s18   ;;  %s30_s22 = sadd.s32 1, %s1626_s17 }
   0x9   : > { %s27_s23 = ssub.s32 %s1630_s18, %s1690_s21  ;;  %p37_p0 = scmp.ne.s32.totalorder %s1626_s17, %s1622_s16 }
   0xa   : > { %p28_p1 = scmp.eq.s32.totalorder %s27_s23, 0  ;;  %p38_p2 = scmp.eq.s32.totalorder %s1630_s18, 0 }
   0xb   : > { %p43_p3 = scmp.ne.s32.totalorder %s1622_s16, %s1618_s15  ;;  %p44_p4 = scmp.eq.s32.totalorder %s1686_s19, 0 }
   0xc   : > { %s1702_s24 = scalar_select %p28_p1, %s1626_s17, %s30_s22  }
   0xd   : > { %p1704_p5 = por %p38_p2, %p37_p0  ;;  %p1708_p6 = por %p44_p4, %p43_p3 }
   0xe   : > { %p135_p7 = scmp.eq.s32.totalorder %s1686_s19, 5  ;;  %p141_p8 = scmp.eq.s32.totalorder %s1162_s20, 5 }
   0xf   : > { %s2069_s26 = scalar_select %p1708_p6, 1, 0 }
  0x10   : > { %p1455_p9 = scmp.lt.s32.totalorder %s1630_s18, 6  ;;  %p1714_p10 = por %p135_p7, %p37_p0 }
  0x11   : > { %p1718_p11 = por %p141_p8, %p43_p3  ;;  %s1723_s29 = sand.u32 1, %s1626_s17  }
  0x12   : > { %s2070_s27 = scalar_select %p1714_p10, 1, 0 }
  0x13   : > { %s2071_s28 = scalar_select %p1718_p11, 1, 0 }
  0x14   : > { %s1212_s30 = sshll.u32 %s1630_s18, 9  ;;  %s1165_s5 = sshll.u32 %s1723_s29, 5 }
  0x15   : > { %s1732_s8 = scalar_lea.hbm %s2061_s0, %s1212_s30  ;;  %s171_s9 = scalar_lea.vmem [#allocation3], %s1165_s5 }
  0x16   : > { %s178_s10 = sshll.u32 %s171_s9, 4  ;;  %p1738_p12 = pnand %p1455_p9, %p1704_p5  ;;  %s1742_s10 = int_to_ptr.vmem [resolvable:$true] %s178_s10 }
  0x17   : > { %s168_s12 = scalar_lea.sflag [#allocation4], %s1723_s29  ;;  %s1500_s13 = scalar_lea.hbm %s1732_s8, 512 }
  0x18   : > { %p1501_p13 = scmp.ne.s32.totalorder %s1732_s8, %s1500_s13  ;;  %p1502_p0 = pneg %p1738_p12 }
  0x19   : > { %s1505_s22 = scalar_lea.hbm %s2061_s0, 3072  ;;  %p1506_p3 = scmp.lt.u32.totalorder %s1732_s8, %s2061_s0 }
  0x1a   : > { %p1503_p1 = pnand %p1502_p0, %p1501_p13  ;;  %p1507_p4 = scmp.lt.u32.totalorder %s1505_s22, %s1500_s13 }
  0x1b   : > { %p1509_p7 = scmp.lt.u32.totalorder %s1500_s13, %s1732_s8 }
  0x1c   : > { %p1504_p2 = pneg %p1503_p1  ;;  %p1508_p5 = por %p1507_p4, %p1506_p3 }
  0x1e   : > { %p1510_p8 = por %p1509_p7, %p1508_p5 }
  0x20   : > { %p1511_p9 = pnand %p1510_p8, %p1504_p2 }
  0x22   : > { %1514 = shalt.err (!%p1511_p9)
}
  0x23   : > { %s1515_s6 = scalar_lea.vmem %s1742_s10, 512  ;;  %s1632_s7 = smov [#allocation3]  }
  0x24   : > { %p1516_p13 = scmp.ne.s32.totalorder %s1742_s10, %s1515_s6  ;;  %s1520_s9 = sshll.u32 %s1632_s7, 4  ;;  %s1521_s9 = int_to_ptr.vmem [resolvable:$false] %s1520_s9 }
  0x25   : > { %s1522_s14 = scalar_lea.vmem %s1521_s9, 1024  ;;  %p1523_p10 = scmp.lt.s32.totalorder %s1742_s10, %s1521_s9 }
  0x26   : > { %p1518_p1 = pnand %p1516_p13, %p1502_p0  ;;  %p1524_p3 = scmp.lt.s32.totalorder %s1522_s14, %s1515_s6 }
  0x28   : > { %p1519_p11 = pneg %p1518_p1  ;;  %p1525_p4 = por %p1524_p3, %p1523_p10 }
  0x2a   : > { %p1526_p5 = pnand %p1525_p4, %p1519_p11 }
  0x2c   : > { %1529 = shalt.err (!%p1526_p5)
}
  0x2d   : > { %s1633_s13 = smov 128   ;;  %s1634_s20 = smov 8  }
  0x2e   : > { %1447 = dma.hbm_to_vmem [thread:$0]  (!%p1738_p12), %s1732_s8, 512, %s1742_s10, %s168_s12, %s1633_s13, %s1633_s13, %s1634_s20  }
  0x2f   : > { %p1171_p10 = scmp.ge.s32.totalorder %s1630_s18, 1  ;;  %p207_p11 = scmp.lt.s32.totalorder %s1630_s18, 7 }
  0x30   : > { %s1786_s6 = scalar_lea.hbm %s2062_s1, %s1212_s30  ;;  %s192_s7 = scalar_lea.vmem [#allocation6], %s1165_s5 }
  0x31   : > { %p1777_p2 = pnand %p1171_p10, %p207_p11  ;;  %s199_s9 = sshll.u32 %s192_s7, 4  ;;  %s1790_s9 = int_to_ptr.vmem [resolvable:$true] %s199_s9 }
  0x32   : > { %s189_s8 = scalar_lea.sflag [#allocation7], %s1723_s29  ;;  %s1530_s10 = scalar_lea.hbm %s1786_s6, 512 }
  0x33   : > { %p1531_p7 = scmp.ne.s32.totalorder %s1786_s6, %s1530_s10  ;;  %s1535_s30 = scalar_lea.hbm %s2062_s1, 3072 }
  0x34   : > { %p1536_p13 = scmp.lt.u32.totalorder %s1786_s6, %s2062_s1  ;;  %p1537_p1 = scmp.lt.u32.totalorder %s1535_s30, %s1530_s10 }
  0x35   : > { %p1533_p8 = pnand %p1531_p7, %p1502_p0  ;;  %p1539_p4 = scmp.lt.u32.totalorder %s1530_s10, %s1786_s6 }
  0x36   : > { %p1538_p3 = por %p1537_p1, %p1536_p13 }
  0x37   : > { %p1534_p9 = pneg %p1533_p8 }
  0x38   : > { %p1540_p5 = por %p1539_p4, %p1538_p3 }
  0x3a   : > { %p1541_p10 = pnand %p1540_p5, %p1534_p9 }
  0x3c   : > { %1544 = shalt.err (!%p1541_p10)
}
  0x3d   : > { %s1545_s5 = scalar_lea.vmem %s1790_s9, 512  ;;  %s1635_s7 = smov [#allocation6]  }
  0x3e   : > { %p1546_p11 = scmp.ne.s32.totalorder %s1790_s9, %s1545_s5  ;;  %s1550_s12 = sshll.u32 %s1635_s7, 4  ;;  %s1551_s12 = int_to_ptr.vmem [resolvable:$false] %s1550_s12 }
  0x3f   : > { %s1552_s14 = scalar_lea.vmem %s1551_s12, 1024  ;;  %p1553_p6 = scmp.lt.s32.totalorder %s1790_s9, %s1551_s12 }
  0x40   : > { %p1548_p7 = pnand %p1546_p11, %p1502_p0  ;;  %p1554_p13 = scmp.lt.s32.totalorder %s1552_s14, %s1545_s5 }
  0x42   : > { %p1549_p8 = pneg %p1548_p7  ;;  %p1555_p1 = por %p1554_p13, %p1553_p6 }
  0x44   : > { %p1556_p3 = pnand %p1555_p1, %p1549_p8 }
  0x46   : > { %1559 = shalt.err (!%p1556_p3)
}
  0x47   : > { %1450 = dma.hbm_to_vmem [thread:$0]  (!%p1738_p12), %s1786_s6, 512, %s1790_s9, %s189_s8, %s1633_s13, %s1633_s13, %s1634_s20  }
  0x48   : > { %211 = sbr.rel (%p1777_p2) target bundleno = 815 (0x32f), region = 36  ;;  %s1824_s10 = sand.u32 (!%p1777_p2), 1, %s1622_s16  }
  0x49   : > { %s1172_s30 = sshll.u32 (!%p1777_p2), %s1824_s10, 5  ;;  %s214_s23 = scalar_lea.sflag (!%p1777_p2), [#allocation4], %s1824_s10 }
  0x4a   : > { %s217_s11 = scalar_lea.vmem (!%p1777_p2), [#allocation3], %s1172_s30  ;;  %p2074_p6 = scmp.ne.s32.totalorder (!%p1777_p2), %s2069_s26, 0 }
  0x4f   : > { %1605 = dma.done.wait (%p2074_p6), %s214_s23, 512  }
  0x50   : > { %1607 = vsyncadd (%p2074_p6), %s214_s23, 4294966784  ;;  %s223_s29 = scalar_lea.sflag [#allocation7], %s1824_s10  ;;  %s226_s13 = scalar_lea.vmem [#allocation6], %s1172_s30 }
  0x51   : > { %1609 = dma.done.wait (%p2074_p6), %s223_s29, 512  }
  0x52   : > { %1611 = vsyncadd (%p2074_p6), %s223_s29, 4294966784  ;;  %vm271_vm0 = vcmask 261120   ;;  %v340_v0 = vld [vmem:[%s2064_s3] sm:$0xff]  ;;  %v341_v1 = vld [vmem:[%s2064_s3 + $0x8] sm:$0xff]  ;;  %v1636_v46 = vmov 0.0|0.0   ;;  %vm1637_vm1 = vmmov 0  }
  0x53   : > { %v342_v2 = vld [vmem:[%s2064_s3 + $0x10] sm:$0xff]  ;;  %v1396_v3 = vpack.c.bf16 %v341_v1, %v340_v0  ;;  %v343_v4 = vld [vmem:[%s2064_s3 + $0x18] sm:$0xff]  ;;  %v1849_v5 = vld [vmem:[%s217_s11] sm:$0xff]  ;;  %1404 = vmatprep.subr.bf16.mxu1 %v1636_v46  ;;  %v1638_v47 = vmov 0.0   ;;  %vm1035_vm2 = vcmask 179200   ;;  %vm1039_vm3 = vcmask 177152  }
  0x54   : > { %v1851_v6 = vld [vmem:[%s217_s11 + $0x8] sm:$0xff]  ;;  %v1400_v7 = vpack.c.bf16 %v343_v4, %v342_v2  ;;  %288 = vst.msk [vmem:[#allocation2] sm:$0xff] %vm271_vm0, %v1849_v5  ;;  %v1857_v8 = vld [vmem:[%s217_s11 + $0x10] sm:$0xff]  ;;  %v1859_v9 = vld [vmem:[%s217_s11 + $0x18] sm:$0xff]  ;;  %v296_v11 = vmul.f32 %v1849_v5, %v1849_v5  ;;  %1319 = vmatprep.mubr.msk.f32.mxu1 %vm1637_vm1, %v1638_v47  ;;  %s254_s20 = scalar_lea.vmem [#allocation8], %s1824_s10  ;;  %s1061_s5 = scalar_lea.sflag [#allocation5], %s1824_s10 }
  0x55   : > { %289 = vst.msk [vmem:[#allocation2 + $0x8] sm:$0xff] %vm271_vm0, %v1851_v6  ;;  %v1861_v10 = vld [vmem:[%s226_s13] sm:$0xff]  ;;  %v297_v12 = vmul.f32 %v1851_v6, %v1851_v6  ;;  %1397 = vmatprep.subr.bf16.mxu0 %v1396_v3  ;;  %290 = vst.msk [vmem:[#allocation2 + $0x10] sm:$0xff] %vm271_vm0, %v1857_v8  ;;  %v1873_v13 = vld [vmem:[%s226_s13 + $0x8] sm:$0xff]  ;;  %v298_v16 = vmul.f32 %v1857_v8, %v1857_v8  ;;  %v299_v17 = vmul.f32 %v1859_v9, %v1859_v9  ;;  %s1073_s22 = sshll.u32 %s254_s20, 4  ;;  %p2075_p0 = scmp.ne.s32.totalorder %s2070_s27, 0  ;;  %s2020_s22 = int_to_ptr.vmem [resolvable:$true] %s1073_s22 }
  0x56   : > { %291 = vst.msk [vmem:[#allocation2 + $0x18] sm:$0xff] %vm271_vm0, %v1859_v9  ;;  %292 = vst.msk [vmem:[#allocation2 + $0x20] sm:$0xff] %vm271_vm0, %v1861_v10  ;;  %v1875_v14 = vld [vmem:[%s226_s13 + $0x10] sm:$0xff]  ;;  %v1877_v15 = vld [vmem:[%s226_s13 + $0x18] sm:$0xff]  ;;  %v304_v18 = vmul.f32 %v1861_v10, %v1861_v10  ;;  %v312_v19 = vmul.f32 %v1861_v10, %v1849_v5  ;;  %1399 = vmatpush3.bf16.msra.mxu0 %v1396_v3  ;;  %v305_v20 = vmul.f32 %v1873_v13, %v1873_v13  ;;  %s1209_s13 = sshll.u32 %s1686_s19, 4  ;;  %s1560_s19 = scalar_lea.vmem %s2020_s22, 16 }
  0x57   : > { %293 = vst.msk [vmem:[#allocation2 + $0x28] sm:$0xff] %vm271_vm0, %v1873_v13  ;;  %294 = vst.msk [vmem:[#allocation2 + $0x30] sm:$0xff] %vm271_vm0, %v1875_v14  ;;  %v306_v21 = vmul.f32 %v1875_v14, %v1875_v14  ;;  %v307_v22 = vmul.f32 %v1877_v15, %v1877_v15  ;;  %v313_v23 = vmul.f32 %v1873_v13, %v1851_v6  ;;  %1401 = vmatprep.subr.bf16.mxu0 %v1400_v7  ;;  %v569_v55 = vld [vmem:[%s2063_s2] sm:$0xff]  ;;  %v570_v59 = vld [vmem:[%s2063_s2 + $0x8] sm:$0xff]  ;;  %s2018_s25 = scalar_lea.hbm %s2065_s4, %s1209_s13  ;;  %p1561_p12 = scmp.ne.s32.totalorder %s2020_s22, %s1560_s19 }
  0x58   : > { %295 = vst.msk [vmem:[#allocation2 + $0x38] sm:$0xff] %vm271_vm0, %v1877_v15  ;;  %300 = vst.msk [vmem:[#allocation2 + $0x40] sm:$0xff] %vm271_vm0, %v296_v11  ;;  %v314_v24 = vmul.f32 %v1875_v14, %v1857_v8  ;;  %v315_v25 = vmul.f32 %v1877_v15, %v1859_v9  ;;  %v571_v63 = vld [vmem:[%s2063_s2 + $0x10] sm:$0x3f]  ;;  %s1639_s7 = smov [#allocation8]  }
  0x59   : > { %301 = vst.msk [vmem:[#allocation2 + $0x48] sm:$0xff] %vm271_vm0, %v297_v12  ;;  %302 = vst.msk [vmem:[#allocation2 + $0x50] sm:$0xff] %vm271_vm0, %v298_v16  ;;  %p1562_p2 = pnand %p1561_p12, %p2075_p0  ;;  %s1564_s26 = sshll.u32 %s1639_s7, 4  ;;  %s1565_s26 = int_to_ptr.vmem [resolvable:$false] %s1564_s26 }
  0x5a   : > { %303 = vst.msk [vmem:[#allocation2 + $0x58] sm:$0xff] %vm271_vm0, %v299_v17  ;;  %308 = vst.msk [vmem:[#allocation2 + $0x60] sm:$0xff] %vm271_vm0, %v304_v18  ;;  %1403 = vmatpush3.bf16.msra.mxu0 %v1400_v7  ;;  %s1566_s12 = scalar_lea.vmem %s1565_s26, 32  ;;  %p1567_p4 = scmp.lt.s32.totalorder %s2020_s22, %s1565_s26 }
  0x5b   : > { %316 = vst.msk [vmem:[#allocation2 + $0x80] sm:$0xff] %vm271_vm0, %v312_v19  ;;  %309 = vst.msk [vmem:[#allocation2 + $0x68] sm:$0xff] %vm271_vm0, %v305_v20  ;;  %v320_v26 = vld [vmem:[#allocation2] sm:$0xff]  ;;  %1428 = vmatprep.subr.bf16.mxu0 %v1636_v46  ;;  %p1563_p9 = pneg %p1562_p2  ;;  %p1568_p5 = scmp.lt.s32.totalorder %s1566_s12, %s1560_s19 }
  0x5c   : > { %310 = vst.msk [vmem:[#allocation2 + $0x70] sm:$0xff] %vm271_vm0, %v306_v21  ;;  %311 = vst.msk [vmem:[#allocation2 + $0x78] sm:$0xff] %vm271_vm0, %v307_v22  ;;  %v321_v27 = vld [vmem:[#allocation2 + $0x8] sm:$0xff]  ;;  %1281 = vmatprep.mubr.msk.f32.mxu0 %vm271_vm0, %v320_v26  ;;  %v322_v28 = vld [vmem:[#allocation2 + $0x10] sm:$0xff]  ;;  %v264_v26 = vsub.f32 %v1851_v6, %v1873_v13 }
  0x5d   : > { %317 = vst.msk [vmem:[#allocation2 + $0x88] sm:$0xff] %vm271_vm0, %v313_v23  ;;  %318 = vst.msk [vmem:[#allocation2 + $0x90] sm:$0xff] %vm271_vm0, %v314_v24  ;;  %1282 = vmatmul.mubr.msk.f32.vlgmr.msra.gmra.mrb[0].mxu0 %vm271_vm0, %v321_v27  ;;  %v323_v29 = vld [vmem:[#allocation2 + $0x18] sm:$0xff]  ;;  %v324_v30 = vld [vmem:[#allocation2 + $0x20] sm:$0xff]  ;;  %v265_v27 = vsub.f32 %v1857_v8, %v1875_v14  ;;  %p1569_p10 = por %p1568_p5, %p1567_p4 }
  0x5e   : > { %319 = vst.msk [vmem:[#allocation2 + $0x98] sm:$0xff] %vm271_vm0, %v315_v25  ;;  %1284 = vmatprep.mubr.msk.f32.mxu0 %vm271_vm0, %v322_v28  ;;  %v325_v31 = vld [vmem:[#allocation2 + $0x28] sm:$0xff]  ;;  %v326_v32 = vld [vmem:[#allocation2 + $0x30] sm:$0xff]  ;;  %v263_v25 = vsub.f32 %v1849_v5, %v1861_v10 }
  0x5f   : > { %v327_v33 = vld [vmem:[#allocation2 + $0x38] sm:$0xff]  ;;  %v328_v34 = vld [vmem:[#allocation2 + $0x40] sm:$0xff]  ;;  %p1570_p11 = pnand %p1569_p10, %p1563_p9 }
  0x60   : > { %v329_v35 = vld [vmem:[#allocation2 + $0x48] sm:$0xff]  ;;  %v330_v36 = vld [vmem:[#allocation2 + $0x50] sm:$0xff]  ;;  %v267_v28 = vmul.f32 %v263_v25, %v263_v25 }
  0x61   : > { %1285 = vmatmul.mubr.msk.f32.gmra.mrb[2].mxu0 %vm271_vm0, %v323_v29  ;;  %v331_v37 = vld [vmem:[#allocation2 + $0x58] sm:$0xff]  ;;  %v332_v38 = vld [vmem:[#allocation2 + $0x60] sm:$0xff]  ;;  %v268_v29 = vmul.f32 %v264_v26, %v264_v26 }
  0x62   : > { %1287 = vmatprep.mubr.msk.f32.mxu0 %vm271_vm0, %v324_v30  ;;  %v333_v39 = vld [vmem:[#allocation2 + $0x68] sm:$0xff]  ;;  %v336_v42 = vld [vmem:[#allocation2 + $0x80] sm:$0xff]  ;;  %v266_v30 = vsub.f32 %v1859_v9, %v1877_v15 }
  0x63   : > { %v334_v40 = vld [vmem:[#allocation2 + $0x70] sm:$0xff]  ;;  %v335_v41 = vld [vmem:[#allocation2 + $0x78] sm:$0xff] }
  0x64   : > { %v337_v43 = vld [vmem:[#allocation2 + $0x88] sm:$0xff]  ;;  %v338_v44 = vld [vmem:[#allocation2 + $0x90] sm:$0xff] }
  0x65   : > { %1288 = vmatmul.mubr.msk.f32.gmra.mrb[4].mxu0 %vm271_vm0, %v325_v31  ;;  %v339_v45 = vld [vmem:[#allocation2 + $0x98] sm:$0xff]  ;;  %v269_v31 = vmul.f32 %v265_v27, %v265_v27 }
  0x66   : > { %1290 = vmatprep.mubr.msk.f32.mxu0 %vm271_vm0, %v326_v32  ;;  %v272_v32 = vsel %vm271_vm0, %v267_v28, 0.0 }
  0x67   : > { %v275_v5 = vsel %vm271_vm0, %v269_v31, 0.0 }
  0x69   : > { %1291 = vmatmul.mubr.msk.f32.gmra.mrb[6].mxu0 %vm271_vm0, %v327_v33  ;;  %v273_v33 = vsel %vm271_vm0, %v268_v29, 0.0 }
  0x6a   : > { %1293 = vmatprep.mubr.msk.f32.mxu0 %vm271_vm0, %v328_v34  ;;  %v274_v34 = vadd.f32 %v273_v33, %v272_v32 }
  0x6c   : > { %v276_v10 = vadd.f32 %v275_v5, %v274_v34 }
  0x6d   : > { %1294 = vmatmul.mubr.msk.f32.gmra.mrb[8].mxu0 %vm271_vm0, %v329_v35  ;;  %v270_v35 = vmul.f32 %v266_v30, %v266_v30 }
  0x6e   : > { %1296 = vmatprep.mubr.msk.f32.mxu0 %vm271_vm0, %v330_v36 }
  0x6f   : > { %v277_v6 = vsel %vm271_vm0, %v270_v35, 0.0 }
  0x70   : > { %v278_v13 = vadd.f32 %v277_v6, %v276_v10 }
  0x71   : > { %1297 = vmatmul.mubr.msk.f32.gmra.mrb[10].mxu0 %vm271_vm0, %v331_v37 }
  0x72   : > { %1299 = vmatprep.mubr.msk.f32.mxu0 %vm271_vm0, %v332_v38  ;;  %279 = vadd.xlane.f32.xlu0 %v278_v13 }
  0x75   : > { %1300 = vmatmul.mubr.msk.f32.gmra.mrb[12].mxu0 %vm271_vm0, %v333_v39 }
  0x76   : > { %1302 = vmatprep.mubr.msk.f32.mxu0 %vm271_vm0, %v334_v40 }
  0x79   : > { %1303 = vmatmul.mubr.msk.f32.gmra.mrb[14].mxu0 %vm271_vm0, %v335_v41 }
  0x7a   : > { %1305 = vmatprep.mubr.msk.f32.mxu0 %vm271_vm0, %v336_v42 }
  0x7d   : > { %1306 = vmatmul.mubr.msk.f32.gmra.mrb[16].mxu0 %vm271_vm0, %v337_v43 }
  0x7e   : > { %1308 = vmatprep.mubr.msk.f32.mxu0 %vm271_vm0, %v338_v44 }
  0x81   : > { %1309 = vmatmul.mubr.msk.f32.gmra.mrb[18].mxu0 %vm271_vm0, %v339_v45 }
  0x82   : > { %1387 = vmatprep.mubr.msk.f32.mxu0 %vm1637_vm1, %v1638_v47 }
 0x130   : > { %v1283_v48 = vpop.f32.mrb[0].mxu0 }
 0x131   : > { %v470_v49 = vpop.f32.mrb[1].mxu0 }
 0x132   : > { %v1405_v50 = vpack.c.bf16 %v1283_v48, %v470_v49 }
 0x134   : > { %v1286_v51 = vpop.f32.mrb[2].mxu0  ;;  %1406 = vmatpush3.bf16.msra.mxu1 %v1405_v50 }
 0x135   : > { %v480_v52 = vpop.f32.mrb[3].mxu0  ;;  %1407 = vmatprep.subr.bf16.mxu1 %v1636_v46 }
 0x136   : > { %v1408_v53 = vpack.c.bf16 %v1286_v51, %v480_v52 }
 0x138   : > { %v1289_v54 = vpop.f32.mrb[4].mxu0  ;;  %1409 = vmatpush3.bf16.msra.mxu1 %v1408_v53 }
 0x139   : > { %v490_v56 = vpop.f32.mrb[5].mxu0  ;;  %1410 = vmatprep.subr.bf16.mxu1 %v1636_v46 }
 0x13a   : > { %v1411_v57 = vpack.c.bf16 %v1289_v54, %v490_v56 }
 0x13b   : > { %1320 = vmatmul.mubr.msk.f32.vlgmr.msra.gmra.mrb[0].mxu1 %vm271_vm0, %v569_v55 }
 0x13c   : > { %v1292_v58 = vpop.f32.mrb[6].mxu0  ;;  %1412 = vmatpush3.bf16.msra.mxu1 %v1411_v57  ;;  %1322 = vmatprep.mubr.msk.f32.mxu1 %vm1637_vm1, %v1638_v47 }
 0x13d   : > { %v500_v60 = vpop.f32.mrb[7].mxu0  ;;  %1413 = vmatprep.subr.bf16.mxu1 %v1636_v46 }
 0x13e   : > { %v1414_v61 = vpack.c.bf16 %v1292_v58, %v500_v60 }
 0x13f   : > { %1323 = vmatmul.mubr.msk.f32.gmra.mrb[2].mxu1 %vm271_vm0, %v570_v59 }
 0x140   : > { %v1295_v62 = vpop.f32.mrb[8].mxu0  ;;  %1415 = vmatpush3.bf16.msra.mxu1 %v1414_v61  ;;  %1325 = vmatprep.mubr.msk.f32.mxu1 %vm1637_vm1, %v1638_v47 }
 0x141   : > { %v510_v0 = vpop.f32.mrb[9].mxu0  ;;  %1416 = vmatprep.subr.bf16.mxu1 %v1636_v46 }
 0x142   : > { %v1417_v1 = vpack.c.bf16 %v1295_v62, %v510_v0 }
 0x143   : > { %1326 = vmatmul.mubr.msk.f32.gmra.mrb[4].mxu1 %vm271_vm0, %v571_v63 }
 0x144   : > { %v1298_v2 = vpop.f32.mrb[10].mxu0  ;;  %1336 = vmatprep.mubr.msk.f32.mxu1 %vm1637_vm1, %v1638_v47 }
 0x145   : > { %v520_v3 = vpop.f32.mrb[11].mxu0 }
 0x146   : > { %v1420_v4 = vpack.c.bf16 %v1298_v2, %v520_v3 }
 0x147   : > { %1337 = vmatmul.mubr.msk.f32.vlgmr.msra.gmra.mrb[6].mxu1 %vm271_vm0, %v569_v55 }
 0x148   : > { %1418 = vmatpush3.bf16.msra.mxu1 %v1417_v1  ;;  %v1301_v7 = vpop.f32.mrb[12].mxu0  ;;  %1339 = vmatprep.mubr.msk.f32.mxu1 %vm1637_vm1, %v1638_v47 }
 0x149   : > { %v530_v11 = vpop.f32.mrb[13].mxu0  ;;  %1419 = vmatprep.subr.bf16.mxu1 %v1636_v46 }
 0x14a   : > { %v1423_v12 = vpack.c.bf16 %v1301_v7, %v530_v11 }
 0x14b   : > { %1340 = vmatmul.mubr.msk.f32.gmra.mrb[8].mxu1 %vm271_vm0, %v570_v59 }
 0x14c   : > { %1421 = vmatpush3.bf16.msra.mxu1 %v1420_v4  ;;  %v1304_v16 = vpop.f32.mrb[14].mxu0  ;;  %1342 = vmatprep.mubr.msk.f32.mxu1 %vm1637_vm1, %v1638_v47 }
 0x14d   : > { %v540_v17 = vpop.f32.mrb[15].mxu0  ;;  %1422 = vmatprep.subr.bf16.mxu1 %v1636_v46 }
 0x14e   : > { %v1426_v18 = vpack.c.bf16 %v1304_v16, %v540_v17 }
 0x14f   : > { %1343 = vmatmul.mubr.msk.f32.gmra.mrb[10].mxu1 %vm271_vm0, %v571_v63 }
 0x150   : > { %v1307_v19 = vpop.f32.mrb[16].mxu0  ;;  %1353 = vmatprep.mubr.msk.f32.mxu1 %vm1637_vm1, %v1638_v47 }
 0x151   : > { %v550_v20 = vpop.f32.mrb[17].mxu0 }
 0x152   : > { %v1429_v21 = vpack.c.bf16 %v1307_v19, %v550_v20 }
 0x153   : > { %1354 = vmatmul.mubr.msk.f32.vlgmr.msra.gmra.mrb[12].mxu1 %vm271_vm0, %v569_v55 }
 0x154   : > { %1424 = vmatpush3.bf16.msra.mxu1 %v1423_v12  ;;  %v1310_v22 = vpop.f32.mrb[18].mxu0  ;;  %1430 = vmatpush3.bf16.msra.mxu0 %v1429_v21 }
 0x155   : > { %v560_v23 = vpop.f32.mrb[19].mxu0  ;;  %1356 = vmatprep.mubr.msk.f32.mxu1 %vm1637_vm1, %v1638_v47  ;;  %1425 = vmatprep.subr.bf16.mxu1 %v1636_v46 }
 0x156   : > { %v1432_v24 = vpack.c.bf16 %v1310_v22, %v560_v23  ;;  %1431 = vmatprep.subr.bf16.mxu0 %v1636_v46 }
 0x157   : > { %1357 = vmatmul.mubr.msk.f32.gmra.mrb[14].mxu1 %vm271_vm0, %v570_v59 }
 0x158   : > { %1427 = vmatpush3.bf16.msra.mxu1 %v1426_v18  ;;  %1433 = vmatpush3.bf16.msra.mxu0 %v1432_v24 }
 0x159   : > { %1359 = vmatprep.mubr.msk.f32.mxu1 %vm1637_vm1, %v1638_v47 }
 0x15b   : > { %1360 = vmatmul.mubr.msk.f32.gmra.mrb[16].mxu1 %vm271_vm0, %v571_v63  ;;  %1388 = vmatmul.mubr.msk.f32.vlgmr.msra.gmra.mrb[20].mxu0 %vm271_vm0, %v569_v55 }
 0x15c   : > { %1370 = vmatprep.mubr.msk.f32.mxu1 %vm1637_vm1, %v1638_v47  ;;  %1390 = vmatprep.mubr.msk.f32.mxu0 %vm1637_vm1, %v1638_v47 }
 0x15f   : > { %1371 = vmatmul.mubr.msk.f32.vlgmr.msra.gmra.mrb[18].mxu1 %vm271_vm0, %v569_v55  ;;  %1391 = vmatmul.mubr.msk.f32.gmra.mrb[22].mxu0 %vm271_vm0, %v570_v59 }
 0x160   : > { %1373 = vmatprep.mubr.msk.f32.mxu1 %vm1637_vm1, %v1638_v47  ;;  %1393 = vmatprep.mubr.msk.f32.mxu0 %vm1637_vm1, %v1638_v47 }
 0x163   : > { %1374 = vmatmul.mubr.msk.f32.gmra.mrb[20].mxu1 %vm271_vm0, %v570_v59  ;;  %1394 = vmatmul.mubr.msk.f32.gmra.mrb[24].mxu0 %vm271_vm0, %v571_v63 }
 0x164   : > { %1376 = vmatprep.mubr.msk.f32.mxu1 %vm1637_vm1, %v1638_v47 }
 0x167   : > { %1377 = vmatmul.mubr.msk.f32.gmra.mrb[22].mxu1 %vm271_vm0, %v571_v63 }
 0x20e   : > { %v647_v8 = vpop.f32.mrb[0].mxu1 }
 0x20f   : > { %v1321_v14 = vpop.f32.mrb[1].mxu1  ;;  %v981_v39 = vmul.f32 %v647_v8, %v647_v8 }
 0x212   : > { %v652_v36 = vpop.f32.mrb[2].mxu1 }
 0x213   : > { %v1324_v37 = vpop.f32.mrb[3].mxu1  ;;  %v982_v45 = vmul.f32 %v652_v36, %v652_v36 }
 0x216   : > { %v657_v38 = vpop.f32.mrb[4].mxu1 }
 0x217   : > { %v1327_v9 = vpop.f32.mrb[5].mxu1  ;;  %v983_v51 = vmul.f32 %v657_v38, %v657_v38 }
 0x21a   : > { %v727_v15 = vpop.f32.mrb[6].mxu1 }
 0x21b   : > { %v984_v40 = vmul.f32 %v727_v15, %v727_v15  ;;  %v987_v41 = vmul.f32 %v727_v15, %v647_v8  ;;  %v1338_v42 = vpop.f32.mrb[7].mxu1 }
 0x21d   : > { %v1014_v43 = vadd.f32 %v984_v40, %v981_v39  ;;  %v999_v0 = vmul.f32 2.0, %v987_v41 }
 0x21e   : > { %v732_v44 = vpop.f32.mrb[8].mxu1 }
 0x21f   : > { %v985_v46 = vmul.f32 %v732_v44, %v732_v44  ;;  %v988_v47 = vmul.f32 %v732_v44, %v652_v36  ;;  %v1341_v48 = vpop.f32.mrb[9].mxu1  ;;  %v1002_v17 = vadd.f32 0.0001, %v999_v0  ;;  %v1017_v23 = vadd.f32 0.0001, %v1014_v43 }
 0x221   : > { %v1015_v49 = vadd.f32 %v985_v46, %v982_v45  ;;  %v1000_v11 = vmul.f32 2.0, %v988_v47 }
 0x222   : > { %v737_v50 = vpop.f32.mrb[10].mxu1 }
 0x223   : > { %v986_v52 = vmul.f32 %v737_v50, %v737_v50  ;;  %v989_v53 = vmul.f32 %v737_v50, %v657_v38  ;;  %v1344_v54 = vpop.f32.mrb[11].mxu1  ;;  %v1003_v27 = vadd.f32 0.0001, %v1000_v11  ;;  %v1018_v14 = vadd.f32 0.0001, %v1015_v49 }
 0x225   : > { %v1016_v55 = vadd.f32 %v986_v52, %v983_v51  ;;  %v1001_v28 = vmul.f32 2.0, %v989_v53 }
 0x226   : > { %v807_v56 = vpop.f32.mrb[12].mxu1 }
 0x227   : > { %v990_v57 = vsub.f32 %v807_v56, %v981_v39  ;;  %v1355_v58 = vpop.f32.mrb[13].mxu1  ;;  %v1004_v36 = vadd.f32 0.0001, %v1001_v28  ;;  %v1019_v43 = vadd.f32 0.0001, %v1016_v55 }
 0x228   : > { %v280_v58 = vpop.xlane.xlu0 %279 }
 0x229   : > { %v281_v55 = vrot.slane %v280_v58, 4 }
 0x22a   : > { %v812_v59 = vpop.f32.mrb[14].mxu1 }
 0x22b   : > { %v991_v60 = vsub.f32 %v812_v59, %v982_v45  ;;  %v1358_v61 = vpop.f32.mrb[15].mxu1  ;;  %v282_v59 = vadd.f32 %v281_v55, %v280_v58 }
 0x22e   : > { %v817_v62 = vpop.f32.mrb[16].mxu1  ;;  %v967_v63 = vpop.f32.mrb[20].mxu0 }
 0x22f   : > { %v992_v1 = vsub.f32 %v817_v62, %v983_v51  ;;  %v996_v2 = vsub.f32 %v967_v63, %v987_v41  ;;  %v1361_v3 = vpop.f32.mrb[17].mxu1  ;;  %v1389_v4 = vpop.f32.mrb[21].mxu0 }
 0x231   : > { %v1005_v7 = vmul.f32 2.0, %v996_v2 }
 0x232   : > { %v887_v12 = vpop.f32.mrb[18].mxu1  ;;  %v972_v16 = vpop.f32.mrb[22].mxu0 }
 0x233   : > { %v1008_v18 = vadd.f32 0.0009, %v1005_v7  ;;  %v993_v19 = vsub.f32 %v887_v12, %v984_v40  ;;  %v997_v20 = vsub.f32 %v972_v16, %v988_v47  ;;  %v1372_v21 = vpop.f32.mrb[19].mxu1  ;;  %v1392_v22 = vpop.f32.mrb[23].mxu0  ;;  %v1051_v12 = vlaneseq }
 0x235   : > { %v1011_v24 = vmul.f32 %v1008_v18, %v1002_v17  ;;  %v1020_v25 = vadd.f32 %v993_v19, %v990_v57  ;;  %v1006_v26 = vmul.f32 2.0, %v997_v20  ;;  %v1052_v16 = vand.u32 127, %v1051_v12 }
 0x236   : > { %v892_v29 = vpop.f32.mrb[20].mxu1  ;;  %v977_v30 = vpop.f32.mrb[24].mxu0 }
 0x237   : > { %v1023_v31 = vadd.f32 0.0009, %v1020_v25  ;;  %v1009_v32 = vadd.f32 0.0009, %v1006_v26  ;;  %v994_v33 = vsub.f32 %v892_v29, %v985_v46  ;;  %v998_v34 = vsub.f32 %v977_v30, %v989_v53  ;;  %v1375_v35 = vpop.f32.mrb[21].mxu1  ;;  %v1395_v5 = vpop.f32.mrb[25].mxu0 }
 0x238   : > { %vm1054_vm4 = vcmp.eq.s32.totalorder %v1052_v16, 1  ;;  %vm1053_vm5 = vcmp.eq.s32.totalorder %v1052_v16, 0 }
 0x239   : > { %v1026_v10 = vmul.f32 %v1023_v31, %v1017_v23  ;;  %v1012_v6 = vmul.f32 %v1009_v32, %v1003_v27  ;;  %v1021_v13 = vadd.f32 %v994_v33, %v991_v60  ;;  %v1007_v8 = vmul.f32 2.0, %v998_v34 }
 0x23a   : > { %v897_v37 = vpop.f32.mrb[22].mxu1  ;;  %v283_v60 = vrot.slane %v282_v59, 2 }
 0x23b   : > { %1494 = vrcp.f32 %v1026_v10  ;;  %v1024_v38 = vadd.f32 0.0009, %v1021_v13  ;;  %v1010_v9 = vadd.f32 0.0009, %v1007_v8  ;;  %v995_v15 = vsub.f32 %v897_v37, %v986_v52  ;;  %v1378_v39 = vpop.f32.mrb[23].mxu1 }
 0x23c   : > { %v284_v61 = vadd.f32 %v283_v60, %v282_v59 }
 0x23d   : > { %v1027_v40 = vmul.f32 %v1024_v38, %v1018_v14  ;;  %v1013_v41 = vmul.f32 %v1010_v9, %v1004_v36  ;;  %v1022_v42 = vadd.f32 %v995_v15, %v992_v1 }
 0x23e   : > { %v285_v62 = vrot.slane %v284_v61, 1 }
 0x23f   : > { %1496 = vrcp.f32 %v1027_v40  ;;  %v1025_v44 = vadd.f32 0.0009, %v1022_v42 }
 0x240   : > { %v286_v63 = vadd.f32 %v285_v62, %v284_v61 }
 0x241   : > { %v1028_v45 = vmul.f32 %v1025_v44, %v1019_v43 }
 0x242   : > { %1434 = vpush %v286_v63 }
 0x243   : > { %1498 = vrcp.f32 %v1028_v45 }
 0x245   : > { %v1495_v46 = vpop.eup %1494 }
 0x246   : > { %v1030_v47 = vmul.f32 %v1495_v46, %v1011_v24 }
 0x248   : > { %v1036_v50 = vsel %vm1035_vm2, %v1030_v47, 0.0 }
 0x249   : > { %v1497_v48 = vpop.eup %1496 }
 0x24a   : > { %v1032_v49 = vmul.f32 %v1497_v48, %v1012_v6 }
 0x24c   : > { %v1037_v51 = vsel %vm1035_vm2, %v1032_v49, 0.0 }
 0x24d   : > { %v1499_v53 = vpop.eup %1498  ;;  %v1038_v54 = vadd.f32 %v1037_v51, %v1036_v50 }
 0x24e   : > { %v1034_v52 = vmul.f32 %v1499_v53, %v1013_v41 }
 0x250   : > { %v1040_v56 = vsel %vm1039_vm3, %v1034_v52, 0.0 }
 0x251   : > { %v1041_v57 = vadd.f32 %v1040_v56, %v1038_v54 }
 0x253   : > { %1042 = vadd.xlane.f32.xlu0 %v1041_v57 }
 0x273   : > { %s1435_s29 = spop %1434 }
 0x274   : > { %v1055_v17 = vstv %s1435_s29 }
 0x275   : > { %v1056_v18 = vsel %vm1054_vm4, %v1055_v17, 0.0 }
 0x2e0   : > { %v1043_v0 = vpop.xlane.xlu0 %1042 }
 0x2e1   : > { %v1044_v1 = vrot.slane %v1043_v0, 4 }
 0x2e3   : > { %v1045_v2 = vadd.f32 %v1044_v1, %v1043_v0 }
 0x2e5   : > { %v1046_v3 = vrot.slane %v1045_v2, 2 }
 0x2e7   : > { %v1047_v4 = vadd.f32 %v1046_v3, %v1045_v2 }
 0x2e9   : > { %v1048_v7 = vrot.slane %v1047_v4, 1 }
 0x2eb   : > { %v1049_v11 = vadd.f32 %v1048_v7, %v1047_v4 }
 0x2ed   : > { %1436 = vpush %v1049_v11 }
 0x31e   : > { %s1437_s6 = spop %1436 }
 0x31f   : > { %v1057_v19 = vstv %s1437_s6 }
 0x320   : > { %v1058_v20 = vsel %vm1053_vm5, %v1057_v19, %v1056_v18 }
 0x321   : > { %1059 = vst [vmem:[%s254_s20] sm:$0x1] %v1058_v20 }
 0x322   : > { %1573 = shalt.err (!%p1570_p11)
}
 0x323   : > { %s1574_s10 = scalar_lea.hbm %s2018_s25, 16  ;;  %s1578_s23 = scalar_lea.hbm %s2065_s4, 96 }
 0x324   : > { %p1575_p7 = scmp.ne.s32.totalorder %s2018_s25, %s1574_s10  ;;  %p1579_p1 = scmp.lt.u32.totalorder %s2018_s25, %s2065_s4 }
 0x325   : > { %p1580_p3 = scmp.lt.u32.totalorder %s1578_s23, %s1574_s10  ;;  %p1582_p12 = scmp.lt.u32.totalorder %s1574_s10, %s2018_s25 }
 0x326   : > { %p1576_p8 = pnand %p1575_p7, %p2075_p0 }
 0x327   : > { %p1581_p6 = por %p1580_p3, %p1579_p1 }
 0x328   : > { %p1577_p13 = pneg %p1576_p8 }
 0x329   : > { %p1583_p2 = por %p1582_p12, %p1581_p6 }
 0x32b   : > { %p1584_p9 = pnand %p1583_p2, %p1577_p13 }
 0x32d   : > { %1587 = shalt.err (!%p1584_p9)
}
 0x32e   : > { %1442 = dma.vmem_to_hbm [thread:$0]  (%p2075_p0), %s2020_s22, 16, %s2018_s25, %s1061_s5  }
 0x32f PF: > { %p1456_p4 = scmp.ge.s32.totalorder %s1630_s18, 2  ;;  %s1085_s13 = sand.u32 1, %s1618_s15  }
 0x330   : > { %p2076_p5 = scmp.ne.s32.totalorder %s2071_s28, 0  ;;  %s1086_s20 = scalar_lea.sflag [#allocation5], %s1085_s13 }
 0x332   : > { %p1452_p10 = pnand %p1456_p4, %p2076_p5 }
 0x334   : > { %1613 = dma.done.wait (!%p1452_p10), %s1086_s20, 16  }
 0x335   : > { %1615 = vsyncadd (!%p1452_p10), %s1086_s20, 4294967280  ;;  %p20_p11 = scmp.ge.s32.totalorder %s1690_s21, 8   ;;  %s2077_s15 = smov %s1622_s16 }
 0x336   : > { %s2078_s16 = smov %s1626_s17  ;;  %s2079_s17 = smov %s1702_s24 }
 0x337   : > { %s2080_s18 = smov %s1690_s21  ;;  %22 = sbr.rel (!%p20_p11) target bundleno = 7 (0x7), region = 94 }
 0x33e   :  { %1090 = vsyncpa [#allocation4], 1 }
 0x33f   :  { %1092 = vsyncpa [#allocation4 + $0x1], 1 }
 0x340   :  { %1093 = vsyncpa [#allocation7], 1 }
 0x341   :  { %1095 = vsyncpa [#allocation7 + $0x1], 1 }
 0x342   :  { %1096 = vsyncpa [#allocation5], 1 }
 0x343   :  { %1098 = vsyncpa [#allocation5 + $0x1], 1 }

</bundles_post_ra>
